<compile_context>
chip_gen: v6e
topology: v6e:2x2x1
jax: 0.10.0
libtpu: 0.0.40
codegen_flags: <defaults>
</compile_context>

<pallas_src>
import jax
import jax.numpy as jnp
from jax.experimental import pallas as pl
from jax.experimental.pallas import tpu as pltpu

LN_EPS = 1e-12  # bert_config.layer_norm_eps


def _round_up(x, m):
    return (x + m - 1) // m * m


def entity_embeddings_kernel(
    ent_ids_ref,   # (TX, 1) int32
    pos_ids_ref,   # (TX, M) int32
    typ_ids_ref,   # (TX, 1) int32
    ent_proj_ref,  # (V, H)  bf16   folded table:  ent_table @ W + b
    pos_tab_ref,   # (P, H)  bf16
    typ_tab_ref,   # (T, H)  f32
    gamma_ref,     # (1, H)  f32
    beta_ref,      # (1, H)  f32
    out_ref,       # (TX, H) f32
):
    f32 = jnp.float32
    TX = ent_ids_ref.shape[0]
    V, H = ent_proj_ref.shape
    P = pos_tab_ref.shape[0]
    T = typ_tab_ref.shape[0]
    M = pos_ids_ref.shape[1]

    # ---- entity path: one (TX,V) one-hot matmul against the folded table ----
    ent_ids = ent_ids_ref[...]                                           # (TX, 1)
    ent_oh = (ent_ids == jax.lax.broadcasted_iota(jnp.int32, (TX, V), 1))
    ent_oh = ent_oh.astype(ent_proj_ref.dtype)                           # bf16, exact
    ent_h = jnp.dot(ent_oh, ent_proj_ref[...], preferred_element_type=f32)  # (TX, H)

    # ---- position path: masked mean fused into a weights @ table matmul ----
    pos_ids = pos_ids_ref[...]                                           # (TX, M)
    valid = pos_ids != -1
    counts = jnp.sum(valid.astype(f32), axis=1, keepdims=True)           # (TX, 1)
    inv = pl.reciprocal(jnp.maximum(counts, 1e-7), approx=True)          # EUP
    clamped = jnp.maximum(pos_ids, 0)
    iota_p = jax.lax.broadcasted_iota(jnp.int32, (TX, P), 1)
    weights = jnp.zeros((TX, P), f32)
    # Accumulate one (TX, P) one-hot per valid position; mask folded into the
    # compare.  M is small & static -> unrolled; live set stays (TX, P).
    for m in range(M):
        col = clamped[:, m:m + 1]                                        # (TX, 1)
        msk = valid[:, m:m + 1]                                          # (TX, 1)
        weights = weights + ((col == iota_p) & msk).astype(f32)
    weights = (weights * inv).astype(pos_tab_ref.dtype)                  # pre-scaled
    pos_h = jnp.dot(weights, pos_tab_ref[...], preferred_element_type=f32)  # (TX, H)

    # ---- type path: T-way VPU select (no K=2 MXU matmul) ----
    typ_ids = typ_ids_ref[...]                                           # (TX, 1)
    typ_h = jnp.broadcast_to(typ_tab_ref[0:1, :], (TX, H))
    for t in range(1, T):
        typ_h = jnp.where(typ_ids == t, typ_tab_ref[t:t + 1, :], typ_h)

    # ---- sum + LayerNorm (f32) ----
    h = ent_h + pos_h + typ_h                                            # (TX, H)
    mean = jnp.mean(h, axis=-1, keepdims=True)
    centered = h - mean
    var = jnp.mean(centered * centered, axis=-1, keepdims=True)
    normed = centered * jax.lax.rsqrt(var + LN_EPS)
    out_ref[...] = (normed * gamma_ref[...] + beta_ref[...]).astype(out_ref.dtype)


def entity_embeddings(entity_ids, pos_ids, typ_ids,
                      ent_table, pos_table, typ_table,
                      w_dense, b_dense, ln_gamma, ln_beta,
                      *, block_x=128):
    X = entity_ids.shape[0]
    M = pos_ids.shape[1]
    V = ent_table.shape[0]
    P, H = pos_table.shape
    T = typ_table.shape[0]

    if typ_ids is None:
        typ_ids = jnp.zeros((X,), jnp.int32)

    # Fold the dense projection + bias into the entity table (inference const).
    ent_proj = ent_table.astype(jnp.float32)
    if w_dense is not None:
        ent_proj = ent_proj @ w_dense.astype(jnp.float32) + b_dense.astype(jnp.float32)
    # bf16 MXU operands; accumulation stays f32 inside the kernel.
    ent_proj = ent_proj.astype(jnp.bfloat16)
    pos_tab = pos_table.astype(jnp.bfloat16)
    typ_tab = typ_table.astype(jnp.float32)
    gamma = ln_gamma.astype(jnp.float32).reshape(1, H)
    beta = ln_beta.astype(jnp.float32).reshape(1, H)

    # Tile X; pad rows to a multiple of the block (>= 8 sublanes).
    tx = min(block_x, _round_up(X, 8))
    Xp = _round_up(X, tx)
    pad = Xp - X
    ent_ids_p = jnp.pad(
        jnp.clip(entity_ids.astype(jnp.int32), 0, V - 1).reshape(X, 1),
        ((0, pad), (0, 0)))
    pos_ids_p = jnp.pad(pos_ids.astype(jnp.int32), ((0, pad), (0, 0)),
                        constant_values=-1)
    typ_ids_p = jnp.pad(
        jnp.clip(typ_ids.astype(jnp.int32), 0, T - 1).reshape(X, 1),
        ((0, pad), (0, 0)))

    grid = (Xp // tx,)
    out = pl.pallas_call(
        entity_embeddings_kernel,
        out_shape=jax.ShapeDtypeStruct((Xp, H), jnp.float32),
        grid=grid,
        in_specs=[
            pl.BlockSpec((tx, 1), lambda i: (i, 0)),   # entity ids
            pl.BlockSpec((tx, M), lambda i: (i, 0)),   # pos ids
            pl.BlockSpec((tx, 1), lambda i: (i, 0)),   # type ids
            pl.BlockSpec((V, H), lambda i: (0, 0)),    # folded entity table (resident)
            pl.BlockSpec((P, H), lambda i: (0, 0)),    # pos table (resident)
            pl.BlockSpec((T, H), lambda i: (0, 0)),    # type table (resident)
            pl.BlockSpec((1, H), lambda i: (0, 0)),    # LN gamma
            pl.BlockSpec((1, H), lambda i: (0, 0)),    # LN beta
        ],
        out_specs=pl.BlockSpec((tx, H), lambda i: (i, 0)),
        compiler_params=pltpu.CompilerParams(
            dimension_semantics=("parallel",),
            vmem_limit_bytes=64 * 1024 * 1024,
        ),
    )(ent_ids_p, pos_ids_p, typ_ids_p, ent_proj, pos_tab, typ_tab, gamma, beta)
    return out[:X]


def entity_embeddings_ref(entity_ids, pos_ids, typ_ids,
                          ent_table, pos_table, typ_table,
                          w_dense, b_dense, ln_gamma, ln_beta):
    """Pure-JAX f32 reference mirroring the PyTorch forward (eval mode)."""
    ent_e = ent_table[entity_ids]                         # (X, E)
    ent_h = ent_e @ w_dense + b_dense                     # (X, H)
    pe = pos_table[jnp.maximum(pos_ids, 0)]               # (X, M, H)
    m = (pos_ids != -1).astype(jnp.float32)[..., None]    # (X, M, 1)
    pos_h = (pe * m).sum(-2) / jnp.maximum(m.sum(-2), 1e-7)
    typ_h = typ_table[typ_ids]                            # (X, H)
    h = ent_h + pos_h + typ_h
    mean = h.mean(-1, keepdims=True)
    var = jnp.mean(jnp.square(h - mean), -1, keepdims=True)
    return (h - mean) * jax.lax.rsqrt(var + LN_EPS) * ln_gamma + ln_beta


if __name__ == "__main__":
    # Small, TPU-friendly shapes consistent with the module.
    X = 8                       # number of entity mentions
    M = 16                      # mention length (second dim of pos_ids)
    ENT_VOCAB = 32              # ent_vocab_size
    ENT_EMBED = 64              # ent_embed_size
    HIDDEN = 128                # ent_hidden_size
    MAX_POS = 128               # bert_config.max_position_embeddings
    TYPE_VOCAB = 2              # bert_config.type_vocab_size

    key = jax.random.PRNGKey(0)
    k = iter(jax.random.split(key, 12))

    # Deterministic synthetic parameters (no checkpoint loading).
    ent_table = 0.02 * jax.random.normal(next(k), (ENT_VOCAB, ENT_EMBED), jnp.float32)
    ent_table = ent_table.at[0].set(0.0)                 # padding_idx=0
    pos_table = 0.02 * jax.random.normal(next(k), (MAX_POS, HIDDEN), jnp.float32)
    typ_table = 0.02 * jax.random.normal(next(k), (TYPE_VOCAB, HIDDEN), jnp.float32)
    w_dense = 0.02 * jax.random.normal(next(k), (ENT_EMBED, HIDDEN), jnp.float32)
    b_dense = 0.02 * jax.random.normal(next(k), (HIDDEN,), jnp.float32)
    ln_gamma = jnp.ones((HIDDEN,), jnp.float32)
    ln_beta = jnp.zeros((HIDDEN,), jnp.float32)

    # Deterministic example inputs.
    entity_ids = jax.random.randint(next(k), (X,), 0, ENT_VOCAB, jnp.int32)
    pos_vals = jax.random.randint(next(k), (X, M), 0, MAX_POS, jnp.int32)
    valid_len = jax.random.randint(next(k), (X, 1), 1, M + 1, jnp.int32)
    col = jnp.arange(M, dtype=jnp.int32)[None, :]
    pos_ids = jnp.where(col < valid_len, pos_vals, -1)   # -1 padding like PyTorch
    typ_ids = jax.random.randint(next(k), (X,), 0, TYPE_VOCAB, jnp.int32)

    out = entity_embeddings(entity_ids, pos_ids, typ_ids,
                            ent_table, pos_table, typ_table,
                            w_dense, b_dense, ln_gamma, ln_beta)
    out = jax.block_until_ready(out)

    ref = entity_embeddings_ref(entity_ids, pos_ids, typ_ids,
                                ent_table, pos_table, typ_table,
                                w_dense, b_dense, ln_gamma, ln_beta)
    assert out.shape == (X, HIDDEN)
    # bf16 table operands (f32 accumulation) -> relaxed tolerance vs f32 ref.
    assert jnp.allclose(out, ref, atol=2e-2, rtol=2e-2), "mismatch vs reference"

    print("KERNEL_OK")
</pallas_src>

<mosaic_0001>
module attributes {stable_mosaic.version = 11 : i64} {
  func.func @entity_embeddings_kernel(%arg0: i32, %arg1: memref<8x1xi32, #tpu.memory_space<vmem>>, %arg2: memref<8x16xi32, #tpu.memory_space<vmem>>, %arg3: memref<8x1xi32, #tpu.memory_space<vmem>>, %arg4: memref<32x128xbf16, #tpu.memory_space<vmem>>, %arg5: memref<128x128xbf16, #tpu.memory_space<vmem>>, %arg6: memref<2x128xf32, #tpu.memory_space<vmem>>, %arg7: memref<1x128xf32, #tpu.memory_space<vmem>>, %arg8: memref<1x128xf32, #tpu.memory_space<vmem>>, %arg9: memref<8x128xf32, #tpu.memory_space<vmem>>) attributes {dimension_semantics = [#tpu.dimension_semantics<parallel>], iteration_bounds = array<i64: 1>, scalar_prefetch = 0 : i64, scratch_operands = 0 : i64, tpu.core_type = #tpu.core_type<tc>, window_params = [{transform_indices = @transform_0, window_bounds = array<i64: 8, 1>}, {transform_indices = @transform_1, window_bounds = array<i64: 8, 16>}, {transform_indices = @transform_2, window_bounds = array<i64: 8, 1>}, {pipeline_mode = #tpu.pipeline_mode<synchronous>, transform_indices = @transform_3, window_bounds = array<i64: 32, 128>}, {pipeline_mode = #tpu.pipeline_mode<synchronous>, transform_indices = @transform_4, window_bounds = array<i64: 128, 128>}, {pipeline_mode = #tpu.pipeline_mode<synchronous>, transform_indices = @transform_5, window_bounds = array<i64: 2, 128>}, {pipeline_mode = #tpu.pipeline_mode<synchronous>, transform_indices = @transform_6, window_bounds = array<i64: 1, 128>}, {pipeline_mode = #tpu.pipeline_mode<synchronous>, transform_indices = @transform_7, window_bounds = array<i64: 1, 128>}, {transform_indices = @transform_8, window_bounds = array<i64: 8, 128>}]} {
    %c0 = arith.constant 0 : index
    %c0_0 = arith.constant 0 : index
    %0 = vector.load %arg1[%c0, %c0_0] : memref<8x1xi32, #tpu.memory_space<vmem>>, vector<8x1xi32>
    %1 = tpu.iota {dimensions = array<i32: 1>} : vector<8x32xi32>
    %2 = vector.broadcast %0 : vector<8x1xi32> to vector<8x32xi32>
    %3 = arith.cmpi eq, %2, %1 : vector<8x32xi32>
    %4 = arith.extui %3 : vector<8x32xi1> to vector<8x32xi32>
    %5 = arith.sitofp %4 : vector<8x32xi32> to vector<8x32xf32>
    %6 = arith.truncf %5 : vector<8x32xf32> to vector<8x32xbf16>
    %c0_1 = arith.constant 0 : index
    %c0_2 = arith.constant 0 : index
    %7 = vector.load %arg4[%c0_1, %c0_2] : memref<32x128xbf16, #tpu.memory_space<vmem>>, vector<32x128xbf16>
    %cst = arith.constant dense<0.000000e+00> : vector<8x128xf32>
    %8 = tpu.matmul %6, %7, %cst {dimension_numbers = #tpu.dot_dimension_numbers<[1], [0], [0], [1], [0, 0, 1, 1], [], []>} : vector<8x32xbf16>, vector<32x128xbf16>, vector<8x128xf32> -> vector<8x128xf32>
    %c0_3 = arith.constant 0 : index
    %c0_4 = arith.constant 0 : index
    %9 = vector.load %arg2[%c0_3, %c0_4] : memref<8x16xi32, #tpu.memory_space<vmem>>, vector<8x16xi32>
    %c-1_i32 = arith.constant -1 : i32
    %10 = vector.broadcast %c-1_i32 : i32 to vector<8x16xi32>
    %11 = arith.cmpi ne, %9, %10 : vector<8x16xi32>
    %12 = arith.extui %11 : vector<8x16xi1> to vector<8x16xi32>
    %13 = arith.sitofp %12 : vector<8x16xi32> to vector<8x16xf32>
    %cst_5 = arith.constant dense<0.000000e+00> : vector<8xf32>
    %14 = vector.multi_reduction <add>, %13, %cst_5 [1] : vector<8x16xf32> to vector<8xf32>
    %15 = vector.shape_cast %14 : vector<8xf32> to vector<8x1xf32>
    %cst_6 = arith.constant 1.000000e-07 : f32
    %16 = vector.broadcast %cst_6 : f32 to vector<8x1xf32>
    %17 = arith.maximumf %15, %16 : vector<8x1xf32>
    %18 = tpu.reciprocal %17 {approx = true} : vector<8x1xf32> -> vector<8x1xf32>
    %c0_i32 = arith.constant 0 : i32
    %19 = vector.broadcast %c0_i32 : i32 to vector<8x16xi32>
    %20 = arith.maxsi %9, %19 : vector<8x16xi32>
    %21 = tpu.iota {dimensions = array<i32: 1>} : vector<8x128xi32>
    %cst_7 = arith.constant 0.000000e+00 : f32
    %22 = vector.broadcast %cst_7 : f32 to vector<8x128xf32>
    %23 = vector.extract_strided_slice %20 {offsets = [0, 0], sizes = [8, 1], strides = [1, 1]} : vector<8x16xi32> to vector<8x1xi32>
    %24 = vector.extract_strided_slice %11 {offsets = [0, 0], sizes = [8, 1], strides = [1, 1]} : vector<8x16xi1> to vector<8x1xi1>
    %25 = vector.broadcast %23 : vector<8x1xi32> to vector<8x128xi32>
    %26 = arith.cmpi eq, %25, %21 : vector<8x128xi32>
    %27 = vector.broadcast %24 : vector<8x1xi1> to vector<8x128xi1>
    %28 = arith.andi %26, %27 : vector<8x128xi1>
    %29 = arith.extui %28 : vector<8x128xi1> to vector<8x128xi32>
    %30 = arith.sitofp %29 : vector<8x128xi32> to vector<8x128xf32>
    %31 = arith.addf %22, %30 : vector<8x128xf32>
    %32 = vector.extract_strided_slice %20 {offsets = [0, 1], sizes = [8, 1], strides = [1, 1]} : vector<8x16xi32> to vector<8x1xi32>
    %33 = vector.extract_strided_slice %11 {offsets = [0, 1], sizes = [8, 1], strides = [1, 1]} : vector<8x16xi1> to vector<8x1xi1>
    %34 = vector.broadcast %32 : vector<8x1xi32> to vector<8x128xi32>
    %35 = arith.cmpi eq, %34, %21 : vector<8x128xi32>
    %36 = vector.broadcast %33 : vector<8x1xi1> to vector<8x128xi1>
    %37 = arith.andi %35, %36 : vector<8x128xi1>
    %38 = arith.extui %37 : vector<8x128xi1> to vector<8x128xi32>
    %39 = arith.sitofp %38 : vector<8x128xi32> to vector<8x128xf32>
    %40 = arith.addf %31, %39 : vector<8x128xf32>
    %41 = vector.extract_strided_slice %20 {offsets = [0, 2], sizes = [8, 1], strides = [1, 1]} : vector<8x16xi32> to vector<8x1xi32>
    %42 = vector.extract_strided_slice %11 {offsets = [0, 2], sizes = [8, 1], strides = [1, 1]} : vector<8x16xi1> to vector<8x1xi1>
    %43 = vector.broadcast %41 : vector<8x1xi32> to vector<8x128xi32>
    %44 = arith.cmpi eq, %43, %21 : vector<8x128xi32>
    %45 = vector.broadcast %42 : vector<8x1xi1> to vector<8x128xi1>
    %46 = arith.andi %44, %45 : vector<8x128xi1>
    %47 = arith.extui %46 : vector<8x128xi1> to vector<8x128xi32>
    %48 = arith.sitofp %47 : vector<8x128xi32> to vector<8x128xf32>
    %49 = arith.addf %40, %48 : vector<8x128xf32>
    %50 = vector.extract_strided_slice %20 {offsets = [0, 3], sizes = [8, 1], strides = [1, 1]} : vector<8x16xi32> to vector<8x1xi32>
    %51 = vector.extract_strided_slice %11 {offsets = [0, 3], sizes = [8, 1], strides = [1, 1]} : vector<8x16xi1> to vector<8x1xi1>
    %52 = vector.broadcast %50 : vector<8x1xi32> to vector<8x128xi32>
    %53 = arith.cmpi eq, %52, %21 : vector<8x128xi32>
    %54 = vector.broadcast %51 : vector<8x1xi1> to vector<8x128xi1>
    %55 = arith.andi %53, %54 : vector<8x128xi1>
    %56 = arith.extui %55 : vector<8x128xi1> to vector<8x128xi32>
    %57 = arith.sitofp %56 : vector<8x128xi32> to vector<8x128xf32>
    %58 = arith.addf %49, %57 : vector<8x128xf32>
    %59 = vector.extract_strided_slice %20 {offsets = [0, 4], sizes = [8, 1], strides = [1, 1]} : vector<8x16xi32> to vector<8x1xi32>
    %60 = vector.extract_strided_slice %11 {offsets = [0, 4], sizes = [8, 1], strides = [1, 1]} : vector<8x16xi1> to vector<8x1xi1>
    %61 = vector.broadcast %59 : vector<8x1xi32> to vector<8x128xi32>
    %62 = arith.cmpi eq, %61, %21 : vector<8x128xi32>
    %63 = vector.broadcast %60 : vector<8x1xi1> to vector<8x128xi1>
    %64 = arith.andi %62, %63 : vector<8x128xi1>
    %65 = arith.extui %64 : vector<8x128xi1> to vector<8x128xi32>
    %66 = arith.sitofp %65 : vector<8x128xi32> to vector<8x128xf32>
    %67 = arith.addf %58, %66 : vector<8x128xf32>
    %68 = vector.extract_strided_slice %20 {offsets = [0, 5], sizes = [8, 1], strides = [1, 1]} : vector<8x16xi32> to vector<8x1xi32>
    %69 = vector.extract_strided_slice %11 {offsets = [0, 5], sizes = [8, 1], strides = [1, 1]} : vector<8x16xi1> to vector<8x1xi1>
    %70 = vector.broadcast %68 : vector<8x1xi32> to vector<8x128xi32>
    %71 = arith.cmpi eq, %70, %21 : vector<8x128xi32>
    %72 = vector.broadcast %69 : vector<8x1xi1> to vector<8x128xi1>
    %73 = arith.andi %71, %72 : vector<8x128xi1>
    %74 = arith.extui %73 : vector<8x128xi1> to vector<8x128xi32>
    %75 = arith.sitofp %74 : vector<8x128xi32> to vector<8x128xf32>
    %76 = arith.addf %67, %75 : vector<8x128xf32>
    %77 = vector.extract_strided_slice %20 {offsets = [0, 6], sizes = [8, 1], strides = [1, 1]} : vector<8x16xi32> to vector<8x1xi32>
    %78 = vector.extract_strided_slice %11 {offsets = [0, 6], sizes = [8, 1], strides = [1, 1]} : vector<8x16xi1> to vector<8x1xi1>
    %79 = vector.broadcast %77 : vector<8x1xi32> to vector<8x128xi32>
    %80 = arith.cmpi eq, %79, %21 : vector<8x128xi32>
    %81 = vector.broadcast %78 : vector<8x1xi1> to vector<8x128xi1>
    %82 = arith.andi %80, %81 : vector<8x128xi1>
    %83 = arith.extui %82 : vector<8x128xi1> to vector<8x128xi32>
    %84 = arith.sitofp %83 : vector<8x128xi32> to vector<8x128xf32>
    %85 = arith.addf %76, %84 : vector<8x128xf32>
    %86 = vector.extract_strided_slice %20 {offsets = [0, 7], sizes = [8, 1], strides = [1, 1]} : vector<8x16xi32> to vector<8x1xi32>
    %87 = vector.extract_strided_slice %11 {offsets = [0, 7], sizes = [8, 1], strides = [1, 1]} : vector<8x16xi1> to vector<8x1xi1>
    %88 = vector.broadcast %86 : vector<8x1xi32> to vector<8x128xi32>
    %89 = arith.cmpi eq, %88, %21 : vector<8x128xi32>
    %90 = vector.broadcast %87 : vector<8x1xi1> to vector<8x128xi1>
    %91 = arith.andi %89, %90 : vector<8x128xi1>
    %92 = arith.extui %91 : vector<8x128xi1> to vector<8x128xi32>
    %93 = arith.sitofp %92 : vector<8x128xi32> to vector<8x128xf32>
    %94 = arith.addf %85, %93 : vector<8x128xf32>
    %95 = vector.extract_strided_slice %20 {offsets = [0, 8], sizes = [8, 1], strides = [1, 1]} : vector<8x16xi32> to vector<8x1xi32>
    %96 = vector.extract_strided_slice %11 {offsets = [0, 8], sizes = [8, 1], strides = [1, 1]} : vector<8x16xi1> to vector<8x1xi1>
    %97 = vector.broadcast %95 : vector<8x1xi32> to vector<8x128xi32>
    %98 = arith.cmpi eq, %97, %21 : vector<8x128xi32>
    %99 = vector.broadcast %96 : vector<8x1xi1> to vector<8x128xi1>
    %100 = arith.andi %98, %99 : vector<8x128xi1>
    %101 = arith.extui %100 : vector<8x128xi1> to vector<8x128xi32>
    %102 = arith.sitofp %101 : vector<8x128xi32> to vector<8x128xf32>
    %103 = arith.addf %94, %102 : vector<8x128xf32>
    %104 = vector.extract_strided_slice %20 {offsets = [0, 9], sizes = [8, 1], strides = [1, 1]} : vector<8x16xi32> to vector<8x1xi32>
    %105 = vector.extract_strided_slice %11 {offsets = [0, 9], sizes = [8, 1], strides = [1, 1]} : vector<8x16xi1> to vector<8x1xi1>
    %106 = vector.broadcast %104 : vector<8x1xi32> to vector<8x128xi32>
    %107 = arith.cmpi eq, %106, %21 : vector<8x128xi32>
    %108 = vector.broadcast %105 : vector<8x1xi1> to vector<8x128xi1>
    %109 = arith.andi %107, %108 : vector<8x128xi1>
    %110 = arith.extui %109 : vector<8x128xi1> to vector<8x128xi32>
    %111 = arith.sitofp %110 : vector<8x128xi32> to vector<8x128xf32>
    %112 = arith.addf %103, %111 : vector<8x128xf32>
    %113 = vector.extract_strided_slice %20 {offsets = [0, 10], sizes = [8, 1], strides = [1, 1]} : vector<8x16xi32> to vector<8x1xi32>
    %114 = vector.extract_strided_slice %11 {offsets = [0, 10], sizes = [8, 1], strides = [1, 1]} : vector<8x16xi1> to vector<8x1xi1>
    %115 = vector.broadcast %113 : vector<8x1xi32> to vector<8x128xi32>
    %116 = arith.cmpi eq, %115, %21 : vector<8x128xi32>
    %117 = vector.broadcast %114 : vector<8x1xi1> to vector<8x128xi1>
    %118 = arith.andi %116, %117 : vector<8x128xi1>
    %119 = arith.extui %118 : vector<8x128xi1> to vector<8x128xi32>
    %120 = arith.sitofp %119 : vector<8x128xi32> to vector<8x128xf32>
    %121 = arith.addf %112, %120 : vector<8x128xf32>
    %122 = vector.extract_strided_slice %20 {offsets = [0, 11], sizes = [8, 1], strides = [1, 1]} : vector<8x16xi32> to vector<8x1xi32>
    %123 = vector.extract_strided_slice %11 {offsets = [0, 11], sizes = [8, 1], strides = [1, 1]} : vector<8x16xi1> to vector<8x1xi1>
    %124 = vector.broadcast %122 : vector<8x1xi32> to vector<8x128xi32>
    %125 = arith.cmpi eq, %124, %21 : vector<8x128xi32>
    %126 = vector.broadcast %123 : vector<8x1xi1> to vector<8x128xi1>
    %127 = arith.andi %125, %126 : vector<8x128xi1>
    %128 = arith.extui %127 : vector<8x128xi1> to vector<8x128xi32>
    %129 = arith.sitofp %128 : vector<8x128xi32> to vector<8x128xf32>
    %130 = arith.addf %121, %129 : vector<8x128xf32>
    %131 = vector.extract_strided_slice %20 {offsets = [0, 12], sizes = [8, 1], strides = [1, 1]} : vector<8x16xi32> to vector<8x1xi32>
    %132 = vector.extract_strided_slice %11 {offsets = [0, 12], sizes = [8, 1], strides = [1, 1]} : vector<8x16xi1> to vector<8x1xi1>
    %133 = vector.broadcast %131 : vector<8x1xi32> to vector<8x128xi32>
    %134 = arith.cmpi eq, %133, %21 : vector<8x128xi32>
    %135 = vector.broadcast %132 : vector<8x1xi1> to vector<8x128xi1>
    %136 = arith.andi %134, %135 : vector<8x128xi1>
    %137 = arith.extui %136 : vector<8x128xi1> to vector<8x128xi32>
    %138 = arith.sitofp %137 : vector<8x128xi32> to vector<8x128xf32>
    %139 = arith.addf %130, %138 : vector<8x128xf32>
    %140 = vector.extract_strided_slice %20 {offsets = [0, 13], sizes = [8, 1], strides = [1, 1]} : vector<8x16xi32> to vector<8x1xi32>
    %141 = vector.extract_strided_slice %11 {offsets = [0, 13], sizes = [8, 1], strides = [1, 1]} : vector<8x16xi1> to vector<8x1xi1>
    %142 = vector.broadcast %140 : vector<8x1xi32> to vector<8x128xi32>
    %143 = arith.cmpi eq, %142, %21 : vector<8x128xi32>
    %144 = vector.broadcast %141 : vector<8x1xi1> to vector<8x128xi1>
    %145 = arith.andi %143, %144 : vector<8x128xi1>
    %146 = arith.extui %145 : vector<8x128xi1> to vector<8x128xi32>
    %147 = arith.sitofp %146 : vector<8x128xi32> to vector<8x128xf32>
    %148 = arith.addf %139, %147 : vector<8x128xf32>
    %149 = vector.extract_strided_slice %20 {offsets = [0, 14], sizes = [8, 1], strides = [1, 1]} : vector<8x16xi32> to vector<8x1xi32>
    %150 = vector.extract_strided_slice %11 {offsets = [0, 14], sizes = [8, 1], strides = [1, 1]} : vector<8x16xi1> to vector<8x1xi1>
    %151 = vector.broadcast %149 : vector<8x1xi32> to vector<8x128xi32>
    %152 = arith.cmpi eq, %151, %21 : vector<8x128xi32>
    %153 = vector.broadcast %150 : vector<8x1xi1> to vector<8x128xi1>
    %154 = arith.andi %152, %153 : vector<8x128xi1>
    %155 = arith.extui %154 : vector<8x128xi1> to vector<8x128xi32>
    %156 = arith.sitofp %155 : vector<8x128xi32> to vector<8x128xf32>
    %157 = arith.addf %148, %156 : vector<8x128xf32>
    %158 = vector.extract_strided_slice %20 {offsets = [0, 15], sizes = [8, 1], strides = [1, 1]} : vector<8x16xi32> to vector<8x1xi32>
    %159 = vector.extract_strided_slice %11 {offsets = [0, 15], sizes = [8, 1], strides = [1, 1]} : vector<8x16xi1> to vector<8x1xi1>
    %160 = vector.broadcast %158 : vector<8x1xi32> to vector<8x128xi32>
    %161 = arith.cmpi eq, %160, %21 : vector<8x128xi32>
    %162 = vector.broadcast %159 : vector<8x1xi1> to vector<8x128xi1>
    %163 = arith.andi %161, %162 : vector<8x128xi1>
    %164 = arith.extui %163 : vector<8x128xi1> to vector<8x128xi32>
    %165 = arith.sitofp %164 : vector<8x128xi32> to vector<8x128xf32>
    %166 = arith.addf %157, %165 : vector<8x128xf32>
    %167 = vector.broadcast %18 : vector<8x1xf32> to vector<8x128xf32>
    %168 = arith.mulf %166, %167 : vector<8x128xf32>
    %169 = arith.truncf %168 : vector<8x128xf32> to vector<8x128xbf16>
    %c0_8 = arith.constant 0 : index
    %c0_9 = arith.constant 0 : index
    %170 = vector.load %arg5[%c0_8, %c0_9] : memref<128x128xbf16, #tpu.memory_space<vmem>>, vector<128x128xbf16>
    %cst_10 = arith.constant dense<0.000000e+00> : vector<8x128xf32>
    %171 = tpu.matmul %169, %170, %cst_10 {dimension_numbers = #tpu.dot_dimension_numbers<[1], [0], [0], [1], [0, 0, 1, 1], [], []>} : vector<8x128xbf16>, vector<128x128xbf16>, vector<8x128xf32> -> vector<8x128xf32>
    %c0_11 = arith.constant 0 : index
    %c0_12 = arith.constant 0 : index
    %172 = vector.load %arg3[%c0_11, %c0_12] : memref<8x1xi32, #tpu.memory_space<vmem>>, vector<8x1xi32>
    %c0_13 = arith.constant 0 : index
    %c0_14 = arith.constant 0 : index
    %173 = vector.load %arg6[%c0_13, %c0_14] : memref<2x128xf32, #tpu.memory_space<vmem>>, vector<1x128xf32>
    %174 = vector.shape_cast %173 : vector<1x128xf32> to vector<1x128xf32>
    %175 = vector.broadcast %174 : vector<1x128xf32> to vector<8x128xf32>
    %c1_i32 = arith.constant 1 : i32
    %176 = vector.broadcast %c1_i32 : i32 to vector<8x1xi32>
    %177 = arith.cmpi eq, %172, %176 : vector<8x1xi32>
    %c1 = arith.constant 1 : index
    %c0_15 = arith.constant 0 : index
    %178 = vector.load %arg6[%c1, %c0_15] : memref<2x128xf32, #tpu.memory_space<vmem>>, vector<1x128xf32>
    %179 = vector.shape_cast %177 : vector<8x1xi1> to vector<8x1xi1>
    %180 = vector.broadcast %179 : vector<8x1xi1> to vector<8x128xi1>
    %181 = vector.shape_cast %178 : vector<1x128xf32> to vector<1x128xf32>
    %182 = vector.broadcast %181 : vector<1x128xf32> to vector<8x128xf32>
    %183 = arith.select %180, %182, %175 : vector<8x128xi1>, vector<8x128xf32>
    %184 = arith.addf %8, %171 : vector<8x128xf32>
    %185 = arith.addf %184, %183 : vector<8x128xf32>
    %cst_16 = arith.constant dense<0.000000e+00> : vector<8xf32>
    %186 = vector.multi_reduction <add>, %185, %cst_16 [1] : vector<8x128xf32> to vector<8xf32>
    %187 = vector.shape_cast %186 : vector<8xf32> to vector<8x1xf32>
    %cst_17 = arith.constant 1.280000e+02 : f32
    %188 = vector.broadcast %cst_17 : f32 to vector<8x1xf32>
    %189 = arith.divf %187, %188 : vector<8x1xf32>
    %190 = vector.broadcast %189 : vector<8x1xf32> to vector<8x128xf32>
    %191 = arith.subf %185, %190 : vector<8x128xf32>
    %192 = arith.mulf %191, %191 : vector<8x128xf32>
    %cst_18 = arith.constant dense<0.000000e+00> : vector<8xf32>
    %193 = vector.multi_reduction <add>, %192, %cst_18 [1] : vector<8x128xf32> to vector<8xf32>
    %194 = vector.shape_cast %193 : vector<8xf32> to vector<8x1xf32>
    %cst_19 = arith.constant 1.280000e+02 : f32
    %195 = vector.broadcast %cst_19 : f32 to vector<8x1xf32>
    %196 = arith.divf %194, %195 : vector<8x1xf32>
    %cst_20 = arith.constant 9.99999996E-13 : f32
    %197 = vector.broadcast %cst_20 : f32 to vector<8x1xf32>
    %198 = arith.addf %196, %197 : vector<8x1xf32>
    %199 = math.rsqrt %198 : vector<8x1xf32>
    %200 = vector.broadcast %199 : vector<8x1xf32> to vector<8x128xf32>
    %201 = arith.mulf %191, %200 : vector<8x128xf32>
    %c0_21 = arith.constant 0 : index
    %c0_22 = arith.constant 0 : index
    %202 = vector.load %arg7[%c0_21, %c0_22] : memref<1x128xf32, #tpu.memory_space<vmem>>, vector<1x128xf32>
    %203 = vector.broadcast %202 : vector<1x128xf32> to vector<8x128xf32>
    %204 = arith.mulf %201, %203 : vector<8x128xf32>
    %c0_23 = arith.constant 0 : index
    %c0_24 = arith.constant 0 : index
    %205 = vector.load %arg8[%c0_23, %c0_24] : memref<1x128xf32, #tpu.memory_space<vmem>>, vector<1x128xf32>
    %206 = vector.broadcast %205 : vector<1x128xf32> to vector<8x128xf32>
    %207 = arith.addf %204, %206 : vector<8x128xf32>
    %c0_25 = arith.constant 0 : index
    %c0_26 = arith.constant 0 : index
    %208 = vector.load %arg9[%c0_25, %c0_26] : memref<8x128xf32, #tpu.memory_space<vmem>>, vector<8x128xf32>
    tpu.vector_store %arg9[%c0_25, %c0_26], %207 {strides = array<i32>} : memref<8x128xf32, #tpu.memory_space<vmem>>, vector<8x128xf32>,
    return
  }
  func.func @transform_0(%arg0: i32) -> (i32, i32) {
    %c0_i32 = arith.constant 0 : i32
    %c0_i32_0 = arith.constant 0 : i32
    return %arg0, %c0_i32 : i32, i32
  }
  func.func @transform_1(%arg0: i32) -> (i32, i32) {
    %c0_i32 = arith.constant 0 : i32
    %c0_i32_0 = arith.constant 0 : i32
    return %arg0, %c0_i32 : i32, i32
  }
  func.func @transform_2(%arg0: i32) -> (i32, i32) {
    %c0_i32 = arith.constant 0 : i32
    %c0_i32_0 = arith.constant 0 : i32
    return %arg0, %c0_i32 : i32, i32
  }
  func.func @transform_3(%arg0: i32) -> (i32, i32) {
    %c0_i32 = arith.constant 0 : i32
    %c0_i32_0 = arith.constant 0 : i32
    %c0_i32_1 = arith.constant 0 : i32
    return %c0_i32, %c0_i32_0 : i32, i32
  }
  func.func @transform_4(%arg0: i32) -> (i32, i32) {
    %c0_i32 = arith.constant 0 : i32
    %c0_i32_0 = arith.constant 0 : i32
    %c0_i32_1 = arith.constant 0 : i32
    return %c0_i32, %c0_i32_0 : i32, i32
  }
  func.func @transform_5(%arg0: i32) -> (i32, i32) {
    %c0_i32 = arith.constant 0 : i32
    %c0_i32_0 = arith.constant 0 : i32
    %c0_i32_1 = arith.constant 0 : i32
    return %c0_i32, %c0_i32_0 : i32, i32
  }
  func.func @transform_6(%arg0: i32) -> (i32, i32) {
    %c0_i32 = arith.constant 0 : i32
    %c0_i32_0 = arith.constant 0 : i32
    %c0_i32_1 = arith.constant 0 : i32
    return %c0_i32, %c0_i32_0 : i32, i32
  }
  func.func @transform_7(%arg0: i32) -> (i32, i32) {
    %c0_i32 = arith.constant 0 : i32
    %c0_i32_0 = arith.constant 0 : i32
    %c0_i32_1 = arith.constant 0 : i32
    return %c0_i32, %c0_i32_0 : i32, i32
  }
  func.func @transform_8(%arg0: i32) -> (i32, i32) {
    %c0_i32 = arith.constant 0 : i32
    %c0_i32_0 = arith.constant 0 : i32
    return %arg0, %c0_i32 : i32, i32
  }
}

</mosaic_0001>

<bundles_post_ra>
// kernel: tpu_custom_call.1
= control target key start
LH: loop header
LB: loop body
LE: loop exit
PB: predicated region body
PF: predicated region fallthrough
CT: control target
= control target key end

     0   :  { %13 = vsyncpa [#allocation3], 0  ;;  %s900_s0 = inlined_call_operand.vmem [shape: s32[8,1], index: 0, kind: input, shape index: {}]   ;;  %s901_s1 = inlined_call_operand.hbm [shape: s32[8,16], index: 1, kind: input, shape index: {}]   ;;  %s902_s2 = inlined_call_operand.vmem [shape: s32[8,1], index: 2, kind: input, shape index: {}]   ;;  %s903_s3 = inlined_call_operand.vmem [shape: bf16[32,128], index: 3, kind: input, shape index: {}]   ;;  %s904_s4 = inlined_call_operand.hbm [shape: bf16[128,128], index: 4, kind: input, shape index: {}]   ;;  %s905_s5 = inlined_call_operand.vmem [shape: f32[2,128], index: 5, kind: input, shape index: {}]   ;;  %s906_s6 = inlined_call_operand.vmem [shape: f32[1,128], index: 6, kind: input, shape index: {}]   ;;  %s907_s7 = inlined_call_operand.vmem [shape: f32[1,128], index: 7, kind: input, shape index: {}]   ;;  %s908_s8 = inlined_call_operand.hbm [shape: f32[8,128], index: 8, kind: output, shape index: {}]  }
   0x1   :  { %14 = vsyncpa [#allocation6], 0 }
   0x2   :  { %15 = vsyncpa [#allocation4], 0  ;;  %s704_s27 = smov [#allocation2]   ;;  %s705_s29 = smov [#allocation5]  }
   0x3   :  { %s24_s28 = sshll.u32 %s704_s27, 4  ;;  %s37_s30 = sshll.u32 %s705_s29, 4  ;;  %s25_s28 = int_to_ptr.vmem [resolvable:$true] %s24_s28  ;;  %s38_s30 = int_to_ptr.vmem [resolvable:$true] %s37_s30 }
   0x4   :  { %s646_s9 = scalar_lea.vmem %s25_s28, 128  ;;  %p651_p1 = scmp.lt.s32.totalorder %s25_s28, %s25_s28 }
   0x5   :  { %p647_p0 = scmp.ne.s32.totalorder %s25_s28, %s646_s9  ;;  %p652_p2 = scmp.lt.s32.totalorder %s646_s9, %s646_s9 }
   0x7   :  { %p653_p3 = por %p652_p2, %p651_p1 }
   0x9   :  { %p654_p4 = pnand %p653_p3, %p647_p0 }
   0xb   :  { %657 = shalt.err (!%p654_p4)
}
   0xc   :  { %27 = dma.hbm_to_vmem [thread:$0]  %s901_s1, 128, %s25_s28, [#allocation3]  }
   0xd   :  { %s666_s12 = scalar_lea.vmem %s38_s30, 1024  ;;  %p671_p6 = scmp.lt.s32.totalorder %s38_s30, %s38_s30 }
   0xe   :  { %p667_p5 = scmp.ne.s32.totalorder %s38_s30, %s666_s12  ;;  %p672_p7 = scmp.lt.s32.totalorder %s666_s12, %s666_s12 }
  0x10   :  { %p673_p8 = por %p672_p7, %p671_p6 }
  0x12   :  { %p674_p9 = pnand %p673_p8, %p667_p5 }
  0x14   :  { %677 = shalt.err (!%p674_p9)
}
  0x15   :  { %s706_s13 = smov 64   ;;  %s707_s14 = smov 4  }
  0x16   :  { %43 = dma.hbm_to_vmem [thread:$0]  %s904_s4, 1024, %s38_s30, [#allocation6], %s706_s13, %s706_s13, %s707_s14  }
  0x17   :  { %698 = dma.done.wait [#allocation3], 128  }
  0x18   :  { %699 = vsyncadd [#allocation3], 4294967168 }
  0x19   :  { %700 = dma.done.wait [#allocation6], 1024  }
  0x1a   :  { %701 = vsyncadd [#allocation6], 4294966272  ;;  %v708_v0 = vmov 1   ;;  %v709_v1 = vmov 0   ;;  %v710_v2 = vmov 0.0   ;;  %v71_v3 = vld [vmem:[#allocation2] sm:$0xff]  ;;  %v58_v50 = vlaneseq }
  0x1b   :  { %598 = vset.pattern.permute.xlu1 %v708_v0  ;;  %597 = vset.pattern.permute.xlu0 %v709_v1  ;;  %vm72_vm0 = vcmp.ne.s32.totalorder %v71_v3, 4294967295  ;;  %vm81_vm1 = vcmp.gt.s32.totalorder %v71_v3, 0  ;;  %v711_v6 = vmov 2   ;;  %v712_v7 = vmov 3   ;;  %v624_v21 = vld [vmem:[#allocation5 + $0x38] sm:$0xff]   ;;  %v625_v22 = vld [vmem:[#allocation5 + $0x30] sm:$0xff]  }
  0x1c   :  { %546 = vmatprep.subr.bf16.mxu0 %v710_v2  ;;  %566 = vmatprep.subr.bf16.mxu1 %v710_v2  ;;  %v781_v4 = vsel %vm81_vm1, %v71_v3, 0  ;;  %v785_v5 = vsel %vm72_vm0, 1, %v709_v1  ;;  %v713_v8 = vmov 4   ;;  %v714_v9 = vmov 5   ;;  %v626_v23 = vld [vmem:[#allocation5 + $0x28] sm:$0xff]   ;;  %v627_v25 = vld [vmem:[#allocation5 + $0x20] sm:$0xff]  }
  0x1d   :  { %96 = vperm.xlu1 %598, %v781_v4   ;;  %84 = vperm.xlu0 %597, %v781_v4   ;;  %v715_v10 = vmov 6   ;;  %v716_v11 = vmov 7   ;;  %v717_v12 = vmov 9   ;;  %v718_v13 = vmov 8   ;;  %v628_v26 = vld [vmem:[#allocation5 + $0x18] sm:$0xff]   ;;  %v629_v27 = vld [vmem:[#allocation5 + $0x10] sm:$0xff]  }
  0x1e   :  { %v719_v14 = vmov 10   ;;  %v502_v15 = vsel %vm72_vm0, 1.0, %v710_v2  ;;  %vm75_vm2 = vcmask 130048   ;;  %v720_v16 = vmov 11   ;;  %547 = vmatpush3.bf16.msra.mxu0 %v624_v21  ;;  %v630_v28 = vld [vmem:[#allocation5 + $0x8] sm:$0xff]   ;;  %v631_v29 = vld [vmem:[%s903_s3 + $0x8] sm:$0xff]  }
  0x1f   :  { %v76_v17 = vsel %vm75_vm2, %v502_v15, 0.0  ;;  %v721_v18 = vmov 12   ;;  %v722_v19 = vmov 14   ;;  %v723_v20 = vmov 15   ;;  %548 = vmatprep.subr.bf16.mxu0 %v710_v2  ;;  %v381_v30 = vld [vmem:[%s902_s2] sm:$0xff]  ;;  %567 = vmatpush3.bf16.msra.mxu1 %v631_v29  ;;  %v632_v31 = vld [vmem:[#allocation5] sm:$0xff]  }
  0x20   :  { %v724_v24 = vmov 13   ;;  %568 = vmatprep.subr.bf16.mxu1 %v710_v2  ;;  %v633_v32 = vld [vmem:[%s903_s3] sm:$0xff]   ;;  %vm387_vm3 = vcmp.eq.s32.totalorder %v381_v30, 1  ;;  %vm725_vm4 = vmmov 0   ;;  %v846_v53 = vand.u32 127, %v58_v50  ;;  %s726_s27 = smov [#allocation7]  }
  0x21   :  { %100 = vperm.xlu1 %598, %v785_v5   ;;  %88 = vperm.xlu0 %597, %v785_v5   ;;  %v57_v33 = vld [vmem:[%s900_s0] sm:$0xff]  ;;  %v389_v34 = vsel %vm387_vm3, 1, %v709_v1  ;;  %s491_s28 = sshll.u32 %s726_s27, 4  ;;  %s492_s28 = int_to_ptr.vmem [resolvable:$true] %s491_s28 }
  0x22   :  { %549 = vmatpush3.bf16.msra.mxu0 %v625_v22  ;;  %562 = vmatprep.mubr.msk.bf16.mxu0 %vm725_vm4, %v710_v2  ;;  %s678_s29 = scalar_lea.vmem %s492_s28, 128  ;;  %p683_p11 = scmp.lt.s32.totalorder %s492_s28, %s492_s28 }
  0x23   :  { %550 = vmatprep.subr.bf16.mxu0 %v710_v2  ;;  %569 = vmatpush3.bf16.msra.mxu1 %v633_v32  ;;  %p679_p10 = scmp.ne.s32.totalorder %s492_s28, %s678_s29  ;;  %p684_p12 = scmp.lt.s32.totalorder %s678_s29, %s678_s29 }
  0x24   :  { %570 = vmatprep.mubr.msk.bf16.mxu1 %vm725_vm4, %v710_v2 }
  0x25   :  { %600 = vset.pattern.permute.xlu1 %v711_v6  ;;  %599 = vset.pattern.permute.xlu0 %v711_v6  ;;  %p685_p13 = por %p684_p12, %p683_p11 }
  0x26   :  { %112 = vperm.xlu1 %600, %v785_v5   ;;  %108 = vperm.xlu0 %599, %v781_v4  }
  0x27   :  { %551 = vmatpush3.bf16.msra.mxu0 %v626_v23  ;;  %p686_p0 = pnand %p685_p13, %p679_p10 }
  0x28   :  { %552 = vmatprep.subr.bf16.mxu0 %v710_v2 }
  0x2a   :  { %601 = vset.pattern.permute.xlu1 %v712_v7  ;;  %602 = vset.pattern.permute.xlu0 %v712_v7 }
  0x2b   :  { %120 = vperm.xlu1 %601, %v781_v4   ;;  %124 = vperm.xlu0 %602, %v785_v5  }
  0x2c   :  { %553 = vmatpush3.bf16.msra.mxu0 %v627_v25 }
  0x2d   :  { %554 = vmatprep.subr.bf16.mxu0 %v710_v2 }
  0x2f   :  { %603 = vset.pattern.permute.xlu1 %v713_v8  ;;  %604 = vset.pattern.permute.xlu0 %v714_v9 }
  0x30   :  { %132 = vperm.xlu1 %603, %v781_v4   ;;  %144 = vperm.xlu0 %604, %v781_v4  }
  0x31   :  { %555 = vmatpush3.bf16.msra.mxu0 %v628_v26 }
  0x32   :  { %556 = vmatprep.subr.bf16.mxu0 %v710_v2 }
  0x34   :  { %136 = vperm.xlu1 %603, %v785_v5   ;;  %606 = vset.pattern.permute.xlu0 %v715_v10 }
  0x35   :  { %156 = vperm.xlu0 %606, %v781_v4   ;;  %557 = vmatpush3.bf16.msra.mxu0 %v629_v27 }
  0x36   :  { %558 = vmatprep.subr.bf16.mxu0 %v710_v2 }
  0x38   :  { %605 = vset.pattern.permute.xlu1 %v714_v9 }
  0x39   :  { %148 = vperm.xlu1 %605, %v785_v5   ;;  %160 = vperm.xlu0 %606, %v785_v5  }
  0x3a   :  { %559 = vmatpush3.bf16.msra.mxu0 %v630_v28 }
  0x3b   :  { %560 = vmatprep.subr.bf16.mxu0 %v710_v2 }
  0x3d   :  { %607 = vset.pattern.permute.xlu0 %v716_v11  ;;  %609 = vset.pattern.permute.xlu1 %v717_v12 }
  0x3e   :  { %168 = vperm.xlu0 %607, %v781_v4   ;;  %561 = vmatpush3.bf16.msra.mxu0 %v632_v31 }
  0x42   :  { %172 = vperm.xlu0 %607, %v785_v5  }
  0x46   :  { %608 = vset.pattern.permute.xlu0 %v718_v13 }
  0x47   :  { %180 = vperm.xlu0 %608, %v781_v4  }
  0x4b   :  { %184 = vperm.xlu0 %608, %v785_v5  }
  0x4f   :  { %610 = vset.pattern.permute.xlu0 %v717_v12 }
  0x50   :  { %196 = vperm.xlu0 %610, %v785_v5  }
  0x54   :  { %611 = vset.pattern.permute.xlu0 %v719_v14 }
  0x55   :  { %204 = vperm.xlu0 %611, %v781_v4  }
  0x59   :  { %613 = vset.pattern.permute.xlu0 %v720_v16 }
  0x5a   :  { %216 = vperm.xlu0 %613, %v781_v4  }
  0x5d   :  { %77 = vadd.xlane.f32.xlu1 %v76_v17 }
  0x5e   :  { %616 = vset.pattern.permute.xlu0 %v721_v18 }
  0x5f   :  { %232 = vperm.xlu0 %616, %v785_v5  }
  0x63   :  { %618 = vset.pattern.permute.xlu0 %v722_v19 }
  0x64   :  { %252 = vperm.xlu0 %618, %v781_v4  }
  0x68   :  { %621 = vset.pattern.permute.xlu0 %v723_v20 }
  0x69   :  { %268 = vperm.xlu0 %621, %v785_v5  }
  0x6d   :  { %623 = vset.pattern.permute.xlu0 %v709_v1 }
  0x6e   :  { %192 = vperm.xlu1 %609, %v781_v4  }
  0x72   :  { %612 = vset.pattern.permute.xlu1 %v719_v14 }
  0x73   :  { %208 = vperm.xlu1 %612, %v785_v5  }
  0x77   :  { %614 = vset.pattern.permute.xlu1 %v720_v16 }
  0x78   :  { %220 = vperm.xlu1 %614, %v785_v5  }
  0x7c   :  { %615 = vset.pattern.permute.xlu1 %v721_v18 }
  0x7d   :  { %228 = vperm.xlu1 %615, %v781_v4  }
  0x81   :  { %617 = vset.pattern.permute.xlu1 %v724_v24 }
  0x82   :  { %240 = vperm.xlu1 %617, %v781_v4  }
  0x86   :  { %244 = vperm.xlu1 %617, %v785_v5  }
  0x8a   :  { %619 = vset.pattern.permute.xlu1 %v722_v19 }
  0x8b   :  { %256 = vperm.xlu1 %619, %v785_v5  }
  0x8f   :  { %620 = vset.pattern.permute.xlu1 %v723_v20 }
  0x90   :  { %264 = vperm.xlu1 %620, %v781_v4  }
  0x94   :  { %622 = vset.pattern.permute.xlu1 %v709_v1 }
  0x95   :  { %61 = vperm.xlu1 %622, %v57_v33  }
  0x98   :  { %v85_v35 = vpop.permute.xlu0 %84  ;;  %v97_v38 = vpop.permute.xlu1 %96 }
  0x99   :  { %391 = vperm.xlu1 %622, %v389_v34   ;;  %vm86_vm6 = vcmp.eq.s32.totalorder %v85_v35, %v846_v53  ;;  %vm98_vm8 = vcmp.eq.s32.totalorder %v97_v38, %v846_v53 }
  0x9c   :  { %v89_v36 = vpop.permute.xlu0 %88  ;;  %v101_v41 = vpop.permute.xlu1 %100 }
  0x9d   :  { %vm102_vm5 = vcmp.eq.s32.totalorder %v101_v41, 1  ;;  %vm90_vm7 = vcmp.eq.s32.totalorder %v89_v36, 1 }
  0x9e   :  { %vm103_vm9 = vmand %vm98_vm8, %vm102_vm5 }
  0x9f   :  { %vm91_vm12 = vmand %vm86_vm6, %vm90_vm7  ;;  %v504_v58 = vsel %vm103_vm9, 1.0, %v710_v2 }
  0xa0   :  { %v503_v59 = vsel %vm91_vm12, 1.0, %v710_v2 }
  0xa1   :  { %v109_v37 = vpop.permute.xlu0 %108  ;;  %v113_v43 = vpop.permute.xlu1 %112  ;;  %v106_v62 = vadd.f32 %v504_v58, %v503_v59 }
  0xa2   :  { %vm114_vm10 = vcmp.eq.s32.totalorder %v113_v43, 1  ;;  %vm110_vm11 = vcmp.eq.s32.totalorder %v109_v37, %v846_v53 }
  0xa3   :  { %vm115_vm15 = vmand %vm110_vm11, %vm114_vm10 }
  0xa4   :  { %v505_v61 = vsel %vm115_vm15, 1.0, %v710_v2 }
  0xa5   :  { %v118_v1 = vadd.f32 %v505_v61, %v106_v62 }
  0xa6   :  { %v125_v39 = vpop.permute.xlu0 %124  ;;  %v121_v45 = vpop.permute.xlu1 %120 }
  0xa7   :  { %vm122_vm13 = vcmp.eq.s32.totalorder %v121_v45, %v846_v53  ;;  %vm126_vm14 = vcmp.eq.s32.totalorder %v125_v39, 1 }
  0xa8   :  { %vm127_vm1 = vmand %vm122_vm13, %vm126_vm14 }
  0xa9   :  { %v506_v0 = vsel %vm127_vm1, 1.0, %v710_v2 }
  0xaa   :  { %v130_v5 = vadd.f32 %v506_v0, %v118_v1 }
  0xab   :  { %v145_v40 = vpop.permute.xlu0 %144  ;;  %v133_v47 = vpop.permute.xlu1 %132 }
  0xac   :  { %vm134_vm2 = vcmp.eq.s32.totalorder %v133_v47, %v846_v53  ;;  %vm146_vm3 = vcmp.eq.s32.totalorder %v145_v40, %v846_v53  ;;  %v528_v47 = vld [vmem:[%s905_s5 + $0x1] ss:$0 sm:$0xff] }
  0xaf   :  { %v137_v49 = vpop.permute.xlu1 %136 }
  0xb0   :  { %v157_v42 = vpop.permute.xlu0 %156  ;;  %vm138_vm0 = vcmp.eq.s32.totalorder %v137_v49, 1 }
  0xb1   :  { %vm139_vm5 = vmand %vm134_vm2, %vm138_vm0  ;;  %vm158_vm7 = vcmp.eq.s32.totalorder %v157_v42, %v846_v53 }
  0xb2   :  { %v507_v4 = vsel %vm139_vm5, 1.0, %v710_v2 }
  0xb3   :  { %v142_v7 = vadd.f32 %v507_v4, %v130_v5  ;;  %v533_v5 = vld [vmem:[%s907_s7] ss:$0 sm:$0xff] }
  0xb4   :  { %v161_v44 = vpop.permute.xlu0 %160  ;;  %v149_v52 = vpop.permute.xlu1 %148 }
  0xb5   :  { %vm150_vm4 = vcmp.eq.s32.totalorder %v149_v52, 1  ;;  %vm162_vm8 = vcmp.eq.s32.totalorder %v161_v44, 1 }
  0xb6   :  { %vm151_vm6 = vmand %vm146_vm3, %vm150_vm4 }
  0xb7   :  { %v508_v6 = vsel %vm151_vm6, 1.0, %v710_v2  ;;  %vm163_vm11 = vmand %vm158_vm7, %vm162_vm8 }
  0xb8   :  { %v154_v10 = vadd.f32 %v508_v6, %v142_v7  ;;  %v509_v11 = vsel %vm163_vm11, 1.0, %v710_v2 }
  0xb9   :  { %v169_v46 = vpop.permute.xlu0 %168 }
  0xba   :  { %vm170_vm9 = vcmp.eq.s32.totalorder %v169_v46, %v846_v53  ;;  %v166_v13 = vadd.f32 %v509_v11, %v154_v10  ;;  %v527_v46 = vld [vmem:[%s905_s5] ss:$0 sm:$0xff] }
  0xbd   :  { %v173_v48 = vpop.permute.xlu0 %172 }
  0xbe   :  { %vm174_vm10 = vcmp.eq.s32.totalorder %v173_v48, 1 }
  0xbf   :  { %vm175_vm14 = vmand %vm170_vm9, %vm174_vm10 }
  0xc0   :  { %v510_v12 = vsel %vm175_vm14, 1.0, %v710_v2 }
  0xc1   :  { %v178_v17 = vadd.f32 %v510_v12, %v166_v13 }
  0xc2   :  { %v181_v51 = vpop.permute.xlu0 %180 }
  0xc3   :  { %vm182_vm12 = vcmp.eq.s32.totalorder %v181_v51, %v846_v53 }
  0xc6   :  { %v185_v55 = vpop.permute.xlu0 %184 }
  0xc7   :  { %vm186_vm13 = vcmp.eq.s32.totalorder %v185_v55, 1 }
  0xc8   :  { %vm187_vm1 = vmand %vm182_vm12, %vm186_vm13 }
  0xc9   :  { %v511_v16 = vsel %vm187_vm1, 1.0, %v710_v2 }
  0xca   :  { %v190_v20 = vadd.f32 %v511_v16, %v178_v17 }
  0xcb   :  { %v197_v57 = vpop.permute.xlu0 %196 }
  0xcc   :  { %vm198_vm0 = vcmp.eq.s32.totalorder %v197_v57, 1 }
  0xd0   :  { %v205_v63 = vpop.permute.xlu0 %204 }
  0xd1   :  { %vm206_vm3 = vcmp.eq.s32.totalorder %v205_v63, %v846_v53 }
  0xd5   :  { %v217_v8 = vpop.permute.xlu0 %216 }
  0xd6   :  { %vm218_vm6 = vcmp.eq.s32.totalorder %v217_v8, %v846_v53 }
  0xda   :  { %v233_v14 = vpop.permute.xlu0 %232 }
  0xdb   :  { %vm234_vm9 = vcmp.eq.s32.totalorder %v233_v14, 1 }
  0xdf   :  { %v253_v22 = vpop.permute.xlu0 %252 }
  0xe4   :  { %v269_v30 = vpop.permute.xlu0 %268 }
  0xe6   :  { %v848_v54 = vpop.xlane.xlu1 %77 }
  0xe7   :  { %v79_v18 = vmax.f32 %v848_v54, 1e-07 }
  0xe9   :  { %634 = vrcp.f32 %v79_v18 }
  0xea   :  { %v193_v56 = vpop.permute.xlu1 %192 }
  0xeb   :  { %vm194_vm15 = vcmp.eq.s32.totalorder %v193_v56, %v846_v53 }
  0xec   :  { %vm199_vm4 = vmand %vm194_vm15, %vm198_vm0  ;;  %vm254_vm15 = vcmp.eq.s32.totalorder %v253_v22, %v846_v53 }
  0xed   :  { %v512_v19 = vsel %vm199_vm4, 1.0, %v710_v2 }
  0xee   :  { %v209_v60 = vpop.permute.xlu1 %208  ;;  %v202_v24 = vadd.f32 %v512_v19, %v190_v20 }
  0xef   :  { %vm210_vm2 = vcmp.eq.s32.totalorder %v209_v60, 1 }
  0xf0   :  { %vm211_vm7 = vmand %vm206_vm3, %vm210_vm2  ;;  %vm270_vm2 = vcmp.eq.s32.totalorder %v269_v30, 1 }
  0xf1   :  { %v513_v23 = vsel %vm211_vm7, 1.0, %v710_v2 }
  0xf2   :  { %v214_v26 = vadd.f32 %v513_v23, %v202_v24 }
  0xf3   :  { %v221_v3 = vpop.permute.xlu1 %220 }
  0xf4   :  { %vm222_vm5 = vcmp.eq.s32.totalorder %v221_v3, 1  ;;  %v532_v3 = vld [vmem:[%s906_s6] ss:$0 sm:$0xff] }
  0xf5   :  { %vm223_vm10 = vmand %vm218_vm6, %vm222_vm5  ;;  %vm411_vm6 = vcmask 261120  }
  0xf6   :  { %v514_v25 = vsel %vm223_vm10, 1.0, %v710_v2  ;;  %v635_v39 = vpop.eup %634 }
  0xf7   :  { %v226_v29 = vadd.f32 %v514_v25, %v214_v26 }
  0xf8   :  { %v229_v9 = vpop.permute.xlu1 %228 }
  0xf9   :  { %vm230_vm8 = vcmp.eq.s32.totalorder %v229_v9, %v846_v53 }
  0xfa   :  { %vm235_vm12 = vmand %vm230_vm8, %vm234_vm9 }
  0xfb   :  { %v515_v27 = vsel %vm235_vm12, 1.0, %v710_v2 }
  0xfc   :  { %v238_v32 = vadd.f32 %v515_v27, %v226_v29 }
  0xfd   :  { %v241_v15 = vpop.permute.xlu1 %240 }
  0xfe   :  { %vm242_vm13 = vcmp.eq.s32.totalorder %v241_v15, %v846_v53 }
 0x101   :  { %v245_v21 = vpop.permute.xlu1 %244 }
 0x102   :  { %vm246_vm11 = vcmp.eq.s32.totalorder %v245_v21, 1 }
 0x103   :  { %vm247_vm14 = vmand %vm242_vm13, %vm246_vm11 }
 0x104   :  { %v516_v31 = vsel %vm247_vm14, 1.0, %v710_v2 }
 0x105   :  { %v250_v34 = vadd.f32 %v516_v31, %v238_v32 }
 0x106   :  { %v257_v28 = vpop.permute.xlu1 %256 }
 0x107   :  { %vm258_vm0 = vcmp.eq.s32.totalorder %v257_v28, 1 }
 0x108   :  { %vm259_vm1 = vmand %vm254_vm15, %vm258_vm0 }
 0x109   :  { %v517_v33 = vsel %vm259_vm1, 1.0, %v710_v2 }
 0x10a   :  { %v262_v36 = vadd.f32 %v517_v33, %v250_v34 }
 0x10b   :  { %v265_v35 = vpop.permute.xlu1 %264 }
 0x10c   :  { %vm266_vm3 = vcmp.eq.s32.totalorder %v265_v35, %v846_v53 }
 0x10d   :  { %vm271_vm4 = vmand %vm266_vm3, %vm270_vm2 }
 0x10e   :  { %v518_v37 = vsel %vm271_vm4, 1.0, %v710_v2 }
 0x10f   :  { %v274_v38 = vadd.f32 %v518_v37, %v262_v36 }
 0x110   :  { %v62_v40 = vpop.permute.xlu1 %61 }
 0x111   :  { %vm63_vm5 = vcmp.eq.s32.totalorder %v62_v40, %v846_v53  ;;  %v275_v41 = vmul.f32 %v635_v39, %v274_v38 }
 0x112   :  { %v501_v42 = vsel %vm63_vm5, 1.0, %v710_v2 }
 0x113   :  { %v66_v43 = vpack.c.bf16 %v501_v42, %v501_v42  ;;  %v276_v44 = vpack.c.bf16 %v275_v41, %v275_v41 }
 0x114   :  { %v392_v45 = vpop.permute.xlu1 %391 }
 0x115   :  { %563 = vmatmul.mubr.bf16.vlgmr.msra.gmra.mxu0 %v276_v44  ;;  %571 = vmatmul.mubr.msk.bf16.vlgmr.msra.gmra.mxu1 %vm411_vm6, %v66_v43  ;;  %vm393_vm7 = vcmp.eq.s32.totalorder %v392_v45, 1 }
 0x116   :  { %v398_v52 = vsel %vm393_vm7, %v528_v47, %v527_v46 }
 0x1d5   :  { %v375_v48 = vpop.f32.mrf.mxu0  ;;  %v449_v49 = vpop.f32.mrf.mxu1 }
 0x1d6   :  { %v450_v50 = vadd.f32 %v449_v49, %v375_v48 }
 0x1d7   :  { %v564_v51 = vpop.f32.mrf.mxu0  ;;  %v572_v2 = vpop.f32.mrf.mxu1 }
 0x1d8   :  { %v455_v53 = vadd.f32 %v450_v50, %v398_v52 }
 0x1d9   :  { %v378_v54 = vpop.f32.mrf.mxu0  ;;  %v452_v55 = vpop.f32.mrf.mxu1 }
 0x1da   :  { %456 = vadd.xlane.f32.xlu0 %v455_v53 }
 0x1db   :  { %v565_v56 = vpop.f32.mrf.mxu0  ;;  %v573_v57 = vpop.f32.mrf.mxu1 }
 0x263   :  { %v457_v58 = vpop.xlane.xlu0 %456 }
 0x264   :  { %v459_v59 = vmul.f32 0.0078125, %v457_v58 }
 0x266   :  { %v460_v60 = vsub.f32 %v455_v53, %v459_v59 }
 0x268   :  { %v461_v61 = vmul.f32 %v460_v60, %v460_v60 }
 0x26a   :  { %462 = vadd.xlane.f32.xlu1 %v461_v61 }
 0x2f3   :  { %v463_v62 = vpop.xlane.xlu1 %462 }
 0x2f4   :  { %v464_v63 = vmul.f32 0.0078125, %v463_v62 }
 0x2f6   :  { %v465_v0 = vadd.f32 1e-12, %v464_v63 }
 0x2f8   :  { %636 = vrsqrt.f32 %v465_v0 }
 0x305   :  { %v637_v1 = vpop.eup %636 }
 0x306   :  { %v467_v4 = vmul.f32 %v637_v1, %v460_v60 }
 0x308   :  { %v475_v6 = vmul.f32 %v532_v3, %v467_v4 }
 0x30a   :  { %v483_v7 = vadd.f32 %v533_v5, %v475_v6 }
 0x30c   :  { %484 = vst [vmem:[#allocation7] sm:$0xff] %v483_v7 }
 0x30d   :  { %689 = shalt.err (!%p686_p0)
}
 0x30e   :  { %494 = dma.vmem_to_hbm [thread:$0]  %s492_s28, 128, %s908_s8, [#allocation4]  }
 0x30f   :  { %702 = dma.done.wait [#allocation4], 128  }
 0x310   :  { %703 = vsyncadd [#allocation4], 4294967168 }
 0x311   :  { %498 = vsyncpa [#allocation3], 1 }
 0x312   :  { %499 = vsyncpa [#allocation6], 1 }
 0x313   :  { %500 = vsyncpa [#allocation4], 1 }

</bundles_post_ra>
